<compile_context>
chip_gen: v5e
topology: v5e:2x2
jax: 0.10.0
libtpu: 0.0.40
codegen_flags: <defaults>
</compile_context>

<pallas_src>
from functools import partial

import jax
import jax.numpy as jnp
from jax.experimental import pallas as pl
from jax.experimental.pallas import tpu as pltpu  # noqa: F401  (TPU backend assumed)


# ----------------------------- Pallas kernel --------------------------------

def encoder_kernel(nodes_ref, ax_ref, w_ref, o_ref, *, n, d):
    # nodes_ref: (Nb, 1)        int32  batch node ids
    # ax_ref:    (N, Kax)       bf16   columns [A_hat (N) | X (D) | zero pad]
    # w_ref:     (3*D, CK_pad)  bf16   stacked+interleaved projection weight
    # o_ref:     (Nb, CK_pad)   f32    padded lane-dense output
    nb = nodes_ref.shape[0]

    # One-hot selection matrix S (Nb, N): row i has a 1 at column nodes[i].
    # (Out-of-range ids silently give an all-zero row; callers must keep ids in [0, N).)
    ids = nodes_ref[...]                                            # (Nb, 1) i32
    cols = jax.lax.broadcasted_iota(jnp.int32, (nb, n), 1)          # (Nb, N) i32
    sel = (cols == ids).astype(jnp.bfloat16)                        # exact 0/1

    ax = ax_ref[...]                                                # (N, Kax) bf16

    # --- batch-only aggregation: 3 chained MXU pushes ---
    g1 = jnp.dot(sel, ax, preferred_element_type=jnp.float32)       # (Nb, Kax)
    a_b = g1[:, :n].astype(jnp.bfloat16)                            # A_hat[nodes] (exact)
    f_b = g1[:, n:n + d]                                            # X[nodes]     f32

    g2 = jnp.dot(a_b, ax, preferred_element_type=jnp.float32)       # (Nb, Kax)
    a2_b = g2[:, :n].astype(jnp.bfloat16)                           # (A_hat^2)[nodes]
    h1_b = g2[:, n:n + d]                                           # agg1(nodes)  f32

    g3 = jnp.dot(a2_b, ax, preferred_element_type=jnp.float32)      # (Nb, Kax)
    h2_b = g3[:, n:n + d]                                           # agg2(nodes)  f32

    # --- fused projection + ReLU: one K=3*D push, full-lane store ---
    proj_in = jnp.concatenate([h1_b, h2_b, f_b], axis=-1).astype(jnp.bfloat16)  # (Nb, 3D)
    acc = jnp.dot(proj_in, w_ref[...], preferred_element_type=jnp.float32)      # (Nb, CK_pad)
    o_ref[...] = jnp.maximum(acc, 0.0)


# ------------------------------- wrapper -------------------------------------

def make_encoder_forward(X, A_hat, W):
    """Build a jitted Encoder.forward(nodes) (args.order == 2).

    X:     (num_nodes, feat_dim) f32   feature table (nn.Embedding weight)
    A_hat: (num_nodes, num_nodes) f32  row-normalized adjacency (mean aggregator)
    W:     (clips, dim, feat_dim) f32  local_weight
    Returned fn: nodes (B0, B1) int32 -> (B0, B1, clips, 3*dim) f32
    """
    N, D = X.shape
    clips, dim, _ = W.shape
    nsrc = 3                                   # [agg1, agg2, feat]
    CK = clips * nsrc * dim                    # 192 at the example sizes
    CK_pad = pl.cdiv(CK, 128) * 128            # 256: unmasked full-lane stores
    Kax = pl.cdiv(N + D, 128) * 128            # 128: lane-aligned fused RHS

    # --- one-time init-cost preprocessing (hoisted out of the call path) ---
    # ax = [A_hat | X | 0] in bf16.
    ax = jnp.zeros((N, Kax), jnp.float32)
    ax = ax.at[:, :N].set(A_hat).at[:, N:N + D].set(X)
    ax = ax.astype(jnp.bfloat16)

    # wcat[s*D + d, c*(3*dim) + s*dim + k] = W[c, k, d], zeros elsewhere / in pad.
    Wt = jnp.transpose(W, (2, 0, 1))                                 # (D, clips, dim)
    blocks = []
    for s in range(nsrc):
        blk = jnp.zeros((D, clips, nsrc, dim), W.dtype).at[:, :, s, :].set(Wt)
        blocks.append(blk.reshape(D, CK))
    wcat = jnp.concatenate(blocks, axis=0)                           # (3D, CK)
    wcat = jnp.zeros((nsrc * D, CK_pad), W.dtype).at[:, :CK].set(wcat)
    wcat = wcat.astype(jnp.bfloat16)

    kernel = partial(encoder_kernel, n=N, d=D)

    def _forward(nodes):
        B0, B1 = nodes.shape
        Nb = B0 * B1
        nodes_col = nodes.reshape(Nb, 1).astype(jnp.int32)

        cost = pl.CostEstimate(
            flops=2 * Nb * N * Kax * 3 + 2 * Nb * (nsrc * D) * CK_pad,
            transcendentals=0,
            bytes_accessed=(Nb * 4 + ax.size * 2 + wcat.size * 2 + Nb * CK_pad * 4),
        )

        out = pl.pallas_call(
            kernel,
            out_shape=jax.ShapeDtypeStruct((Nb, CK_pad), jnp.float32),
            cost_estimate=cost,
        )(nodes_col, ax, wcat)

        # Column ordering is already [clip][source][dim]; drop lane padding.
        return out[:, :CK].reshape(B0, B1, clips, nsrc * dim)

    return jax.jit(_forward)


# --------------------------------- main ---------------------------------------

if __name__ == "__main__":
    key = jax.random.PRNGKey(0)
    num_nodes, feat_dim = 64, 32   # features.weight.shape
    clips, dim = 4, 16             # args.clips, args.dim  (args.order = 2)
    B0, B1 = 2, 8                  # nodes batch shape

    k_feat, k_w, k_adj, k_nodes = jax.random.split(key, 4)

    # nn.Embedding weight ~ N(0, 1)
    X = jax.random.normal(k_feat, (num_nodes, feat_dim), jnp.float32)

    # init.xavier_uniform on (clips, dim, feat_dim)
    fan_in, fan_out = dim * feat_dim, clips * feat_dim
    bound = (6.0 / (fan_in + fan_out)) ** 0.5
    W = jax.random.uniform(k_w, (clips, dim, feat_dim), jnp.float32, -bound, bound)

    # deterministic sparse-ish adjacency, row-normalized (mean aggregation)
    adj = (jax.random.uniform(k_adj, (num_nodes, num_nodes)) < 0.1).astype(jnp.float32)
    diag = jnp.arange(num_nodes)
    adj = adj.at[diag, diag].set(1.0)  # avoid empty neighborhoods
    A_hat = adj / jnp.sum(adj, axis=1, keepdims=True)

    nodes = jax.random.randint(k_nodes, (B0, B1), 0, num_nodes, jnp.int32)

    encoder_forward = make_encoder_forward(X, A_hat, W)   # init-time preprocessing
    out = encoder_forward(nodes)
    out = jax.block_until_ready(out)
    assert out.shape == (B0, B1, clips, 3 * dim), out.shape
    assert bool(jnp.all(out >= 0.0))  # ReLU applied

    # f32 pure-JAX reference (full-neighborhood mean, same semantics as the kernel)
    h1_full = A_hat @ X
    h2_full = A_hat @ h1_full
    nodes_flat = nodes.reshape(-1)
    srcs = [h1_full[nodes_flat], h2_full[nodes_flat], X[nodes_flat]]
    parts = [jnp.einsum('ckd,nd->nck', W, f) for f in srcs]
    ref = jax.nn.relu(jnp.concatenate(parts, axis=-1)).reshape(B0, B1, clips, 3 * dim)
    assert bool(jnp.allclose(out, ref, atol=3e-2, rtol=3e-2)), (
        float(jnp.max(jnp.abs(out - ref))))

    print("KERNEL_OK")
</pallas_src>

<mosaic_0001>
module attributes {stable_mosaic.version = 11 : i64} {
  func.func @encoder_kernel(%arg0: memref<16x1xi32, #tpu.memory_space<vmem>>, %arg1: memref<64x128xbf16, #tpu.memory_space<vmem>>, %arg2: memref<96x256xbf16, #tpu.memory_space<vmem>>, %arg3: memref<16x256xf32, #tpu.memory_space<vmem>>) attributes {dimension_semantics = [], scalar_prefetch = 0 : i64, scratch_operands = 0 : i64, tpu.core_type = #tpu.core_type<tc>} {
    %c0 = arith.constant 0 : index
    %c0_0 = arith.constant 0 : index
    %0 = vector.load %arg0[%c0, %c0_0] : memref<16x1xi32, #tpu.memory_space<vmem>>, vector<16x1xi32>
    %1 = tpu.iota {dimensions = array<i32: 1>} : vector<16x64xi32>
    %2 = vector.broadcast %0 : vector<16x1xi32> to vector<16x64xi32>
    %3 = arith.cmpi eq, %1, %2 : vector<16x64xi32>
    %4 = arith.extui %3 : vector<16x64xi1> to vector<16x64xi32>
    %5 = arith.sitofp %4 : vector<16x64xi32> to vector<16x64xf32>
    %6 = arith.truncf %5 : vector<16x64xf32> to vector<16x64xbf16>
    %c0_1 = arith.constant 0 : index
    %c0_2 = arith.constant 0 : index
    %7 = vector.load %arg1[%c0_1, %c0_2] : memref<64x128xbf16, #tpu.memory_space<vmem>>, vector<64x128xbf16>
    %cst = arith.constant dense<0.000000e+00> : vector<16x128xf32>
    %8 = tpu.matmul %6, %7, %cst {dimension_numbers = #tpu.dot_dimension_numbers<[1], [0], [0], [1], [0, 0, 1, 1], [], []>} : vector<16x64xbf16>, vector<64x128xbf16>, vector<16x128xf32> -> vector<16x128xf32>
    %9 = vector.extract_strided_slice %8 {offsets = [0, 0], sizes = [16, 64], strides = [1, 1]} : vector<16x128xf32> to vector<16x64xf32>
    %10 = arith.truncf %9 : vector<16x64xf32> to vector<16x64xbf16>
    %11 = vector.extract_strided_slice %8 {offsets = [0, 64], sizes = [16, 32], strides = [1, 1]} : vector<16x128xf32> to vector<16x32xf32>
    %cst_3 = arith.constant dense<0.000000e+00> : vector<16x128xf32>
    %12 = tpu.matmul %10, %7, %cst_3 {dimension_numbers = #tpu.dot_dimension_numbers<[1], [0], [0], [1], [0, 0, 1, 1], [], []>} : vector<16x64xbf16>, vector<64x128xbf16>, vector<16x128xf32> -> vector<16x128xf32>
    %13 = vector.extract_strided_slice %12 {offsets = [0, 0], sizes = [16, 64], strides = [1, 1]} : vector<16x128xf32> to vector<16x64xf32>
    %14 = arith.truncf %13 : vector<16x64xf32> to vector<16x64xbf16>
    %15 = vector.extract_strided_slice %12 {offsets = [0, 64], sizes = [16, 32], strides = [1, 1]} : vector<16x128xf32> to vector<16x32xf32>
    %cst_4 = arith.constant dense<0.000000e+00> : vector<16x128xf32>
    %16 = tpu.matmul %14, %7, %cst_4 {dimension_numbers = #tpu.dot_dimension_numbers<[1], [0], [0], [1], [0, 0, 1, 1], [], []>} : vector<16x64xbf16>, vector<64x128xbf16>, vector<16x128xf32> -> vector<16x128xf32>
    %17 = vector.extract_strided_slice %16 {offsets = [0, 64], sizes = [16, 32], strides = [1, 1]} : vector<16x128xf32> to vector<16x32xf32>
    %18 = tpu.concatenate %15, %17, %11 in 1 : vector<16x32xf32>, vector<16x32xf32>, vector<16x32xf32> -> vector<16x96xf32>
    %19 = arith.truncf %18 : vector<16x96xf32> to vector<16x96xbf16>
    %c0_5 = arith.constant 0 : index
    %c0_6 = arith.constant 0 : index
    %20 = vector.load %arg2[%c0_5, %c0_6] : memref<96x256xbf16, #tpu.memory_space<vmem>>, vector<96x256xbf16>
    %cst_7 = arith.constant dense<0.000000e+00> : vector<16x256xf32>
    %21 = tpu.matmul %19, %20, %cst_7 {dimension_numbers = #tpu.dot_dimension_numbers<[1], [0], [0], [1], [0, 0, 1, 1], [], []>} : vector<16x96xbf16>, vector<96x256xbf16>, vector<16x256xf32> -> vector<16x256xf32>
    %cst_8 = arith.constant 0.000000e+00 : f32
    %22 = vector.broadcast %cst_8 : f32 to vector<16x256xf32>
    %23 = arith.maximumf %21, %22 : vector<16x256xf32>
    %c0_9 = arith.constant 0 : index
    %c0_10 = arith.constant 0 : index
    %24 = vector.load %arg3[%c0_9, %c0_10] : memref<16x256xf32, #tpu.memory_space<vmem>>, vector<16x256xf32>
    tpu.vector_store %arg3[%c0_9, %c0_10], %23 {strides = array<i32>} : memref<16x256xf32, #tpu.memory_space<vmem>>, vector<16x256xf32>,
    return
  }
}

</mosaic_0001>

<bundles_post_ra>
// kernel: _forward.1
= control target key start
LH: loop header
LB: loop body
LE: loop exit
PB: predicated region body
PF: predicated region fallthrough
CT: control target
= control target key end

     0   :  { %8 = vsyncpa [#allocation3], 0  ;;  %s518_s0 = inlined_call_operand.vmem [shape: s32[16,1], index: 0, kind: input, shape index: {}]   ;;  %s519_s1 = inlined_call_operand.hbm [shape: bf16[64,128], index: 1, kind: input, shape index: {}]   ;;  %s520_s2 = inlined_call_operand.hbm [shape: bf16[96,256], index: 2, kind: input, shape index: {}]   ;;  %s521_s3 = inlined_call_operand.vmem [shape: f32[16,256], index: 3, kind: output, shape index: {}]  }
   0x1   :  { %s16_s14 = sshll.u32 %s519_s1, 4  ;;  %s17_s14 = int_to_ptr.hbm [resolvable:$true] %s16_s14 }
   0x2   :  { %9 = vsyncpa [#allocation5], 0  ;;  %s449_s15 = smov [#allocation2]   ;;  %s29_s19 = sshll.u32 %s520_s2, 4  ;;  %s30_s19 = int_to_ptr.hbm [resolvable:$true] %s29_s19 }
   0x3   :  { %s18_s16 = sshll.u32 %s449_s15, 4  ;;  %s450_s20 = smov 64   ;;  %s19_s16 = int_to_ptr.vmem [resolvable:$true] %s18_s16 }
   0x4   :  { %s451_s21 = smov 4   ;;  %s452_s22 = smov [#allocation4]  }
   0x5   :  { %24 = dma.hbm_to_vmem [thread:$0]  %s17_s14, 512, %s19_s16, [#allocation3], %s450_s20, %s450_s20, %s451_s21  }
   0x6   :  { %s31_s23 = sshll.u32 %s452_s22, 4  ;;  %s453_s24 = smov 128   ;;  %s32_s23 = int_to_ptr.vmem [resolvable:$true] %s31_s23 }
   0x7   :  { %s454_s1 = smov 8  }
   0x8   :  { %37 = dma.hbm_to_vmem [thread:$0]  %s30_s19, 1536, %s32_s23, [#allocation5], %s453_s24, %s453_s24, %s454_s1  }
   0x9   :  { %445 = dma.done.wait [#allocation3], 512  }
   0xa   :  { %446 = vsyncadd [#allocation3], 4294966784 }
   0xb   :  { %447 = dma.done.wait [#allocation5], 1536  }
   0xc   :  { %448 = vsyncadd [#allocation5], 4294965760  ;;  %v455_v0 = vmov 0   ;;  %v47_v1 = vld [vmem:[%s518_s0] sm:$0xff]  ;;  %v364_v2 = vld [vmem:[#allocation2 + $0x18] sm:$0xff]  ;;  %v49_v7 = vlaneseq  ;;  %v456_v11 = vmov 0.0  }
   0xd   :  { %386 = vset.pattern.permute.xlu0 %v455_v0  ;;  %104 = vmatpush.bf16.msra.mxu1 %v364_v2  ;;  %v48_v3 = vld [vmem:[%s518_s0 + $0x8] sm:$0xff]  ;;  %v363_v4 = vld [vmem:[#allocation2 + $0x10] sm:$0xff]  ;;  %v361_v6 = vld [vmem:[#allocation2] sm:$0xff]  ;;  %vm96_vm2 = vcmask 523264   ;;  %s457_s0 = smov 96   ;;  %vm166_vm3 = vcmask 261120  }
   0xe   :  { %52 = vperm.xlu0 %386, %v47_v1   ;;  %140 = vmatpush.bf16.msra.mxu2 %v364_v2  ;;  %v362_v5 = vld [vmem:[#allocation2 + $0x8] sm:$0xff]  ;;  %v50_v9 = vand.u32 127, %v49_v7  ;;  %v353_v22 = vld [vmem:[#allocation4 + $0x50] sm:$0xf]  ;;  %v376_v23 = vld [vmem:[#allocation4 + $0x54] sm:$0xf0] }
   0xf   :  { %v375_v24 = vld [vmem:[#allocation4 + $0x54] sm:$0xf]  ;;  %v354_v25 = vor.u32 %v376_v23, %v353_v22  ;;  %v355_v26 = vld [vmem:[#allocation4 + $0x58] sm:$0xf0]  ;;  %v345_v27 = vld [vmem:[#allocation4 + $0x40] sm:$0xf] }
  0x10   :  { %v374_v28 = vld [vmem:[#allocation4 + $0x44] sm:$0xf0]  ;;  %v358_v29 = vor.u32 %v375_v24, %v355_v26  ;;  %v373_v30 = vld [vmem:[#allocation4 + $0x44] sm:$0xf]  ;;  %v347_v31 = vld [vmem:[#allocation4 + $0x48] sm:$0xf0] }
  0x11   :  { %105 = vmatpush.bf16.msra.mxu1 %v363_v4  ;;  %250 = vmatpush.bf16.msra.mxu3 %v354_v25  ;;  %v346_v32 = vor.u32 %v374_v28, %v345_v27  ;;  %v350_v33 = vor.u32 %v373_v30, %v347_v31  ;;  %v337_v34 = vld [vmem:[#allocation4 + $0x30] sm:$0xf]  ;;  %v372_v35 = vld [vmem:[#allocation4 + $0x34] sm:$0xf0]  ;;  %v371_v36 = vld [vmem:[#allocation4 + $0x34] sm:$0xf] }
  0x12   :  { %141 = vmatpush.bf16.msra.mxu2 %v363_v4  ;;  %264 = vmatpush.bf16.msra.mxu0 %v358_v29  ;;  %v339_v37 = vld [vmem:[#allocation4 + $0x38] sm:$0xf0]  ;;  %v338_v38 = vor.u32 %v372_v35, %v337_v34  ;;  %v329_v40 = vld [vmem:[#allocation4 + $0x20] sm:$0xf]  ;;  %v370_v41 = vld [vmem:[#allocation4 + $0x24] sm:$0xf0] }
  0x13   :  { %v342_v39 = vor.u32 %v371_v36, %v339_v37  ;;  %v369_v42 = vld [vmem:[#allocation4 + $0x24] sm:$0xf]  ;;  %v331_v43 = vld [vmem:[#allocation4 + $0x28] sm:$0xf0]  ;;  %v330_v44 = vor.u32 %v370_v41, %v329_v40  ;;  %v321_v46 = vld [vmem:[#allocation4 + $0x10] sm:$0xf] }
  0x14   :  { %v334_v45 = vor.u32 %v369_v42, %v331_v43  ;;  %v368_v47 = vld [vmem:[#allocation4 + $0x14] sm:$0xf0]  ;;  %v367_v48 = vld [vmem:[#allocation4 + $0x14] sm:$0xf]  ;;  %v323_v49 = vld [vmem:[#allocation4 + $0x18] sm:$0xf0] }
  0x15   :  { %106 = vmatpush.bf16.msra.mxu1 %v362_v5  ;;  %251 = vmatpush.bf16.msra.mxu3 %v346_v32  ;;  %v322_v50 = vor.u32 %v368_v47, %v321_v46  ;;  %v326_v51 = vor.u32 %v367_v48, %v323_v49  ;;  %v313_v55 = vld [vmem:[#allocation4] sm:$0xf]  ;;  %v366_v56 = vld [vmem:[#allocation4 + $0x4] sm:$0xf0]  ;;  %v365_v57 = vld [vmem:[#allocation4 + $0x4] sm:$0xf] }
  0x16   :  { %55 = vperm.xlu0 %386, %v48_v3   ;;  %142 = vmatpush.bf16.msra.mxu2 %v362_v5  ;;  %v314_v58 = vor.u32 %v366_v56, %v313_v55  ;;  %v315_v59 = vld [vmem:[#allocation4 + $0x8] sm:$0xf0]  ;;  %vm244_vm4 = vcmask 785408  }
  0x17   :  { %265 = vmatpush.bf16.msra.mxu0 %v350_v33  ;;  %v318_v60 = vor.u32 %v365_v57, %v315_v59 }
  0x19   :  { %107 = vmatpush.bf16.msra.mxu1 %v361_v6  ;;  %252 = vmatpush.bf16.msra.mxu3 %v338_v38 }
  0x1a   :  { %143 = vmatpush.bf16.msra.mxu2 %v361_v6 }
  0x1b   :  { %266 = vmatpush.bf16.msra.mxu0 %v342_v39 }
  0x1d   :  { %122 = vmatpush.bf16.msrb.mxu1 %v364_v2  ;;  %253 = vmatpush.bf16.msra.mxu3 %v330_v44 }
  0x1f   :  { %267 = vmatpush.bf16.msra.mxu0 %v334_v45 }
  0x21   :  { %123 = vmatpush.bf16.msrb.mxu1 %v363_v4  ;;  %254 = vmatpush.bf16.msra.mxu3 %v322_v50 }
  0x23   :  { %268 = vmatpush.bf16.msra.mxu0 %v326_v51 }
  0x25   :  { %124 = vmatpush.bf16.msrb.mxu1 %v362_v5  ;;  %255 = vmatpush.bf16.msra.mxu3 %v314_v58 }
  0x27   :  { %269 = vmatpush.bf16.msra.mxu0 %v318_v60 }
  0x29   :  { %125 = vmatpush.bf16.msrb.mxu1 %v361_v6 }
  0x80   :  { %v53_v8 = vpop.permute.xlu0 %52 }
  0x81   :  { %vm57_vm0 = vcmp.eq.s32.totalorder %v50_v9, %v53_v8 }
  0x82   :  { %v290_v12 = vsel %vm57_vm0, 1.0, %v456_v11 }
  0x88   :  { %v56_v10 = vpop.permute.xlu0 %55 }
  0x89   :  { %vm58_vm1 = vcmp.eq.s32.totalorder %v50_v9, %v56_v10 }
  0x8a   :  { %v291_v13 = vsel %vm58_vm1, 1.0, %v456_v11 }
  0x8b   :  { %v63_v14 = vpack.c.bf16 %v291_v13, %v290_v12 }
  0x8d   :  { %308 = vmatmul.msk.bf16.vlgmr.msra.gmra.mxu1 %vm96_vm2, %v63_v14 }
 0x10a   :  { %v493_v15 = vpop.f32.mrf.mxu1 }
 0x112   :  { %v495_v16 = vpop.f32.mrf.mxu1 }
 0x113   :  { %v114_v17 = vpack.c.bf16 %v495_v16, %v493_v15 }
 0x115   :  { %309 = vmatmul.msk.bf16.vlgmr.msrb.gmra.mxu1 %vm96_vm2, %v114_v17 }
 0x192   :  { %v127_v18 = vpop.f32.mrf.mxu1 }
 0x19a   :  { %v129_v19 = vpop.f32.mrf.mxu1 }
 0x19b   :  { %v132_v20 = vpack.c.bf16 %v129_v19, %v127_v18  ;;  %v387_v21 = vpack.i.bf16 %v129_v19, %v127_v18 }
 0x19d   :  { %388 = vrot.lane.b32.xlu1 %v387_v21, %s450_s20  ;;  %310 = vmatmul.msk.bf16.vlgmr.msra.gmra.mxu2 %vm96_vm2, %v132_v20 }
 0x20f   :  { %v389_v61 = vpop.permute.xlu1 %388 }
 0x210   :  { %v391_v63 = vunpack.i.h.bf16 %v389_v61  ;;  %v390_v0 = vunpack.i.l.bf16 %v389_v61 }
 0x220   :  { %v145_v52 = vpop.f32.mrf.mxu2 }
 0x228   :  { %v147_v53 = vpop.f32.mrf.mxu2 }
 0x229   :  { %v392_v54 = vpack.i.bf16 %v147_v53, %v145_v52 }
 0x22b   :  { %393 = vrot.lane.b32.xlu1 %v392_v54, %s457_s0 }
 0x29d   :  { %v394_v62 = vpop.permute.xlu1 %393 }
 0x29e   :  { %v396_v1 = vunpack.i.h.bf16 %v394_v62  ;;  %v395_v2 = vunpack.i.l.bf16 %v394_v62 }
 0x2a0   :  { %v168_v3 = vsel %vm166_vm3, %v391_v63, %v396_v1  ;;  %v167_v4 = vsel %vm166_vm3, %v390_v0, %v395_v2 }
 0x2a1   :  { %v169_v5 = vsel %vm96_vm2, %v167_v4, %v493_v15  ;;  %v170_v6 = vsel %vm96_vm2, %v168_v3, %v495_v16 }
 0x2a2   :  { %v171_v7 = vpack.c.bf16 %v170_v6, %v169_v5 }
 0x2a4   :  { %359 = vmatmul.msk.bf16.vlgmr.msra.gmra.mxu3 %vm244_vm4, %v171_v7  ;;  %360 = vmatmul.msk.bf16.vlgmr.msra.gmra.mxu0 %vm244_vm4, %v171_v7 }
 0x321   :  { %v271_v8 = vpop.f32.mrf.mxu0 }
 0x322   :  { %v277_v9 = vmax.f32 %v271_v8, 0.0 }
 0x324   :  { %281 = vst [vmem:[%s521_s3 + $0x8] sm:$0xff] %v277_v9 }
 0x327   :  { %v257_v10 = vpop.f32.mrf.mxu3 }
 0x328   :  { %v276_v11 = vmax.f32 %v257_v10, 0.0 }
 0x329   :  { %v273_v12 = vpop.f32.mrf.mxu0 }
 0x32a   :  { %280 = vst [vmem:[%s521_s3] sm:$0xff] %v276_v11  ;;  %v279_v13 = vmax.f32 %v273_v12, 0.0 }
 0x32c   :  { %283 = vst [vmem:[%s521_s3 + $0x18] sm:$0xff] %v279_v13 }
 0x32f   :  { %v259_v14 = vpop.f32.mrf.mxu3 }
 0x330   :  { %v278_v15 = vmax.f32 %v259_v14, 0.0 }
 0x332   :  { %282 = vst [vmem:[%s521_s3 + $0x10] sm:$0xff] %v278_v15 }
 0x333   :  { %288 = vsyncpa [#allocation3], 1 }
 0x334   :  { %289 = vsyncpa [#allocation5], 1 }

</bundles_post_ra>
